<compile_context>
chip_gen: v6e
topology: v6e:2x2x1
jax: 0.10.0
libtpu: 0.0.40
codegen_flags: <defaults>
</compile_context>

<pallas_src>
import functools
import math

import jax
import jax.numpy as jnp
from jax.experimental import pallas as pl
from jax.experimental.pallas import tpu as pltpu

F32 = jnp.float32
BF16 = jnp.bfloat16

K_SEC = {2: 3, 3: 4, 4: 6, 5: 3}
GROUPS = 16
BN_EPS = 1e-5


# ------------------------------ tiling helper ---------------------------------

def _choose_tm(m, row_bytes):
    """Pick an M-tile: multiple of 8 (or the full dim), <= ~2 MiB of LHS rows,
    preferring one that divides m exactly so no padded rows are written."""
    cap = max(8, min(1024, (2 * 1024 * 1024) // max(1, row_bytes)))
    cap = (cap // 8) * 8
    if m <= cap:
        return m, m
    for tm in range(cap, 7, -8):
        if m % tm == 0:
            return tm, m
    tm = cap
    return tm, ((m + tm - 1) // tm) * tm


# ------------------------------ Pallas kernels ---------------------------------

def _mm1x1_kernel(x_ref, s_ref, b_ref, w_ref, o_ref):
    # fused BN (folded affine) + ReLU on the LHS, then 1x1x1 conv as a matmul
    h = jnp.maximum(x_ref[...] * s_ref[...] + b_ref[...], 0.0)
    o_ref[...] = jnp.dot(h.astype(BF16), w_ref[...],
                         preferred_element_type=jnp.float32)


def _mm1x1_res_kernel(x_ref, s_ref, b_ref, w_ref, r_ref, o_ref):
    h = jnp.maximum(x_ref[...] * s_ref[...] + b_ref[...], 0.0)
    o_ref[...] = r_ref[...] + jnp.dot(h.astype(BF16), w_ref[...],
                                      preferred_element_type=jnp.float32)


def _make_gconv_kernel(g, kg, ng, with_res, with_bn):
    """Grouped (or dense, g=1) conv-as-matmul.

    p_ref : (tm, g*kg)  bf16 im2col columns, channel-major within each group
    w_ref : (g, kg, ng) bf16 packed weights
    optional s_ref/b_ref (1, g*ng): output-side BN+ReLU epilogue (conv1)
    optional r_ref (tm, g*ng): fused residual add
    o_ref : (tm, g*ng)  f32, lane-dense
    """
    def kernel(*refs):
        idx = 0
        p_ref = refs[idx]; idx += 1
        w_ref = refs[idx]; idx += 1
        if with_bn:
            s_ref = refs[idx]
            b_ref = refs[idx + 1]
            idx += 2
        if with_res:
            r_ref = refs[idx]
            idx += 1
        o_ref = refs[idx]
        for gi in range(g):
            lhs = p_ref[...] if g == 1 else p_ref[:, gi * kg:(gi + 1) * kg]
            acc = jnp.dot(lhs, w_ref[gi], preferred_element_type=jnp.float32)
            if with_bn:
                acc = jnp.maximum(acc * s_ref[:, gi * ng:(gi + 1) * ng]
                                  + b_ref[:, gi * ng:(gi + 1) * ng], 0.0)
            if with_res:
                acc = acc + r_ref[:, gi * ng:(gi + 1) * ng]
            if g == 1:
                o_ref[...] = acc
            else:
                o_ref[:, gi * ng:(gi + 1) * ng] = acc
    return kernel


def _maxpool_kernel(p_ref, o_ref):
    # p_ref: (taps, tm, C) -> max over taps
    r = p_ref[0]
    for t in range(1, p_ref.shape[0]):
        r = jnp.maximum(r, p_ref[t])
    o_ref[...] = r


def _head_kernel(x_ref, s_ref, b_ref, w_ref, fb_ref, o_ref):
    # tail BN+ReLU -> global average pool -> Linear, all fused in one kernel
    h = jnp.maximum(x_ref[0] * s_ref[...] + b_ref[...], 0.0)          # (L, C)
    m = jnp.sum(h, axis=0, keepdims=True) * (1.0 / x_ref.shape[1])    # (1, C)
    o_ref[...] = jnp.dot(m.astype(BF16), w_ref[...],
                         preferred_element_type=jnp.float32) + fb_ref[...]


# ------------------------- cached pallas_call factories ------------------------

@functools.lru_cache(maxsize=None)
def _mm1x1_call(mp, cin, cout, tm, with_res):
    kernel = _mm1x1_res_kernel if with_res else _mm1x1_kernel
    in_specs = [
        pl.BlockSpec((tm, cin), lambda i: (i, 0)),
        pl.BlockSpec((1, cin), lambda i: (0, 0)),
        pl.BlockSpec((1, cin), lambda i: (0, 0)),
        pl.BlockSpec((cin, cout), lambda i: (0, 0)),
    ]
    if with_res:
        in_specs.append(pl.BlockSpec((tm, cout), lambda i: (i, 0)))
    return pl.pallas_call(
        kernel,
        out_shape=jax.ShapeDtypeStruct((mp, cout), F32),
        grid=(mp // tm,),
        in_specs=in_specs,
        out_specs=pl.BlockSpec((tm, cout), lambda i: (i, 0)),
        compiler_params=pltpu.CompilerParams(
            dimension_semantics=("parallel",)),
    )


@functools.lru_cache(maxsize=None)
def _gconv_call(mp, kfull, g, kg, ng, tm, with_res, with_bn):
    kernel = _make_gconv_kernel(g, kg, ng, with_res, with_bn)
    cout = g * ng
    in_specs = [
        pl.BlockSpec((tm, kfull), lambda i: (i, 0)),
        pl.BlockSpec((g, kg, ng), lambda i: (0, 0, 0)),
    ]
    if with_bn:
        in_specs += [pl.BlockSpec((1, cout), lambda i: (0, 0)),
                     pl.BlockSpec((1, cout), lambda i: (0, 0))]
    if with_res:
        in_specs.append(pl.BlockSpec((tm, cout), lambda i: (i, 0)))
    return pl.pallas_call(
        kernel,
        out_shape=jax.ShapeDtypeStruct((mp, cout), F32),
        grid=(mp // tm,),
        in_specs=in_specs,
        out_specs=pl.BlockSpec((tm, cout), lambda i: (i, 0)),
        compiler_params=pltpu.CompilerParams(
            dimension_semantics=("parallel",)),
    )


@functools.lru_cache(maxsize=None)
def _maxpool_call(mp, taps, c, tm):
    return pl.pallas_call(
        _maxpool_kernel,
        out_shape=jax.ShapeDtypeStruct((mp, c), F32),
        grid=(mp // tm,),
        in_specs=[pl.BlockSpec((taps, tm, c), lambda i: (0, i, 0))],
        out_specs=pl.BlockSpec((tm, c), lambda i: (i, 0)),
        compiler_params=pltpu.CompilerParams(
            dimension_semantics=("parallel",)),
    )


@functools.lru_cache(maxsize=None)
def _head_call(n, l, c, nc):
    return pl.pallas_call(
        _head_kernel,
        out_shape=jax.ShapeDtypeStruct((n, nc), F32),
        grid=(n,),
        in_specs=[pl.BlockSpec((1, l, c), lambda i: (i, 0, 0)),
                  pl.BlockSpec((1, c), lambda i: (0, 0)),
                  pl.BlockSpec((1, c), lambda i: (0, 0)),
                  pl.BlockSpec((c, nc), lambda i: (0, 0)),
                  pl.BlockSpec((1, nc), lambda i: (0, 0))],
        out_specs=pl.BlockSpec((1, nc), lambda i: (i, 0)),
        compiler_params=pltpu.CompilerParams(
            dimension_semantics=("parallel",)),
    )


# ------------------------------- layer wrappers ---------------------------------

def _out_dims(shape, kernel, stride, pad):
    _, t, h, w, _ = shape
    to = (t + 2 * pad[0] - kernel[0]) // stride[0] + 1
    ho = (h + 2 * pad[1] - kernel[1]) // stride[1] + 1
    wo = (w + 2 * pad[2] - kernel[2]) // stride[2] + 1
    return to, ho, wo


def _extract_tap_slices(xp, out_dims, kernel, stride):
    n, c = xp.shape[0], xp.shape[-1]
    to, ho, wo = out_dims
    kt, kh, kw = kernel
    st, sh, sw = stride
    taps = []
    for dt in range(kt):
        for dh in range(kh):
            for dw in range(kw):
                taps.append(jax.lax.slice(
                    xp,
                    (0, dt, dh, dw, 0),
                    (n, dt + (to - 1) * st + 1, dh + (ho - 1) * sh + 1,
                     dw + (wo - 1) * sw + 1, c),
                    (1, st, sh, sw, 1)))
    return taps


def conv_spatial(x_act, p, kernel, stride, pad, groups=1,
                 residual=None, out_bn=False):
    """Spatial (grouped) conv, PyTorch Conv3d semantics (bias=False), as one
    Pallas matmul kernel per M-tile with lane-dense (M, Cout) output.

    x_act : (N,T,H,W,Cin) with the preceding BN+ReLU already applied
            (or the raw network input for conv1).
    p['w']: packed (g, cg*taps, ng) bf16; p['scale'/'shift'] are used as an
            output-side BN+ReLU epilogue when out_bn=True (conv1 only).
    """
    n, _, _, _, cin = x_act.shape
    g = groups
    cg = cin // g
    taps = kernel[0] * kernel[1] * kernel[2]
    kg = cg * taps
    kfull = cin * taps
    ng = p['w'].shape[-1]
    cout = g * ng

    xp = jnp.pad(x_act, ((0, 0), (pad[0], pad[0]), (pad[1], pad[1]),
                         (pad[2], pad[2]), (0, 0)))
    out_dims = _out_dims(x_act.shape, kernel, stride, pad)
    tap_slices = _extract_tap_slices(xp, out_dims, kernel, stride)
    to, ho, wo = out_dims
    m = n * to * ho * wo
    # channel-major / tap-minor columns: each group's K-slice is contiguous,
    # so no group-major transpose of the patch tensor is needed.
    pcols = jnp.stack(tap_slices, axis=-1).reshape(m, kfull).astype(BF16)

    tm, mp = _choose_tm(m, kfull * 2)
    if mp != m:
        pcols = jnp.pad(pcols, ((0, mp - m), (0, 0)))
    args = [pcols, p['w']]
    if out_bn:
        args += [p['scale'], p['shift']]
    if residual is not None:
        r = residual.reshape(m, cout)
        if mp != m:
            r = jnp.pad(r, ((0, mp - m), (0, 0)))
        args.append(r)
    out = _gconv_call(mp, kfull, g, kg, ng, tm,
                      residual is not None, out_bn)(*args)
    return out[:m].reshape(n, to, ho, wo, cout)


def conv1x1_bn(x, p, residual=None, stride=(1, 1, 1)):
    """BN -> ReLU -> 1x1x1 Conv3d (bias free), fused into one Pallas kernel,
    with an optional fused residual add."""
    if stride != (1, 1, 1):
        # BN/ReLU are elementwise, so subsampling first is equivalent; a
        # strided 1x1x1 conv is a subsample followed by the dense matmul.
        x = x[:, ::stride[0], ::stride[1], ::stride[2], :]
    n, t, h, w, cin = x.shape
    cout = p['w'].shape[-1]
    m = n * t * h * w
    x2 = x.reshape(m, cin)
    tm, mp = _choose_tm(m, cin * 4)
    if mp != m:
        x2 = jnp.pad(x2, ((0, mp - m), (0, 0)))
    args = [x2, p['scale'], p['shift'], p['w']]
    if residual is not None:
        r = residual.reshape(m, cout)
        if mp != m:
            r = jnp.pad(r, ((0, mp - m), (0, 0)))
        args.append(r)
    out = _mm1x1_call(mp, cin, cout, tm, residual is not None)(*args)
    return out[:m].reshape(n, t, h, w, cout)


def bn_relu_jnp(x, p):
    # BN (folded affine) + ReLU ahead of a *padded* grouped conv; plain jnp so
    # XLA fuses it with the im2col gather (the conv padding must see true 0s).
    return jnp.maximum(x * p['scale'][0] + p['shift'][0], 0.0)


def maxpool3d(x, kernel=(1, 3, 3), stride=(1, 2, 2), pad=(0, 1, 1)):
    n, _, _, _, c = x.shape
    neg = float(jnp.finfo(F32).min)
    xp = jnp.pad(x, ((0, 0), (pad[0], pad[0]), (pad[1], pad[1]),
                     (pad[2], pad[2]), (0, 0)), constant_values=neg)
    out_dims = _out_dims(x.shape, kernel, stride, pad)
    taps = _extract_tap_slices(xp, out_dims, kernel, stride)
    to, ho, wo = out_dims
    ntaps = len(taps)
    m = n * to * ho * wo
    p = jnp.stack(taps, axis=0).reshape(ntaps, m, c)
    tm, mp = _choose_tm(m, ntaps * c * 4)
    if mp != m:
        p = jnp.pad(p, ((0, 0), (0, mp - m), (0, 0)), constant_values=neg)
    out = _maxpool_call(mp, ntaps, c, tm)(p)
    return out[:m].reshape(n, to, ho, wo, c)


# --------------------------------- MFNet blocks ---------------------------------

def mf_unit(x, p, stride, first_block):
    h = conv1x1_bn(x, p['i1'])
    x_in = conv1x1_bn(h, p['i2'], residual=x)              # x + conv_i2(h)
    a = bn_relu_jnp(x_in, p['m1'])
    h = conv_spatial(a, p['m1'], (3, 3, 3), stride, (1, 1, 1), groups=GROUPS)
    if first_block:
        sc = conv1x1_bn(x, p['w1'], stride=stride)          # conv_w1(x)
        h = conv1x1_bn(h, p['m2'], residual=sc)             # conv_m2(h) + x'
    else:
        a2 = bn_relu_jnp(h, p['m2'])
        h = conv_spatial(a2, p['m2'], (1, 3, 3), (1, 1, 1), (0, 1, 1),
                         groups=GROUPS, residual=x)         # conv_m2(h) + x
    return h


def mfnet3d_forward(params, x, num_segments=16):
    # x: (N, 3, T, H, W); the reference view() is an identity reshape here.
    x = x.reshape((-1, 3, num_segments) + x.shape[-2:])
    assert x.shape[2] == 16
    x = jnp.transpose(x, (0, 2, 3, 4, 1)).astype(F32)       # -> (N, T, H, W, C)

    # conv1: Conv3d(3,16,(3,5,5),p=(1,2,2),s=(1,2,2)) -> BN -> ReLU
    # (BN+ReLU fused as the epilogue of the conv matmul kernel)
    h = conv_spatial(x, params['conv1'], (3, 5, 5), (1, 2, 2), (1, 2, 2),
                     groups=1, out_bn=True)
    # MaxPool3d k=(1,3,3), s=(1,2,2), p=(0,1,1)
    h = maxpool3d(h)

    for s in (2, 3, 4, 5):
        for i, blk in enumerate(params['conv%d' % s]):
            first = (i == 0)
            stride = ((2, 1, 1) if s == 2 else (1, 2, 2)) if first else (1, 1, 1)
            h = mf_unit(h, blk, stride, first)

    # tail BN+ReLU + global average pool + classifier fused in one kernel.
    # (AvgPool3d((8,7,7), stride=1) equals a global mean at the canonical
    # 224x224 resolution; generalized to the whole remaining feature map.)
    n, t, hh, ww, c = h.shape
    nc = params['fc']['w'].shape[-1]
    out = _head_call(n, t * hh * ww, c, nc)(
        h.reshape(n, t * hh * ww, c),
        params['tail']['scale'], params['tail']['shift'],
        params['fc']['w'], params['fc']['b'])
    return out


# ------------------------------ parameter setup ---------------------------------

def _init_bn(key, c):
    k1, k2 = jax.random.split(key)
    return dict(gamma=1.0 + 0.05 * jax.random.normal(k1, (c,), F32),
                beta=0.05 * jax.random.normal(k2, (c,), F32),
                mean=jnp.zeros((c,), F32),
                var=jnp.ones((c,), F32))


def _init_conv(key, cout, cin, kernel, g=1):
    cg = cin // g
    shape = (cout, cg) + tuple(kernel)
    fan_in = cg * kernel[0] * kernel[1] * kernel[2]
    fan_out = (cout // g) * kernel[0] * kernel[1] * kernel[2]
    std = math.sqrt(2.0 / (fan_in + fan_out))
    return std * jax.random.normal(key, shape, F32)


def init_params(key, num_classes=16):
    """Random parameters in PyTorch layout (Conv3d / BatchNorm3d / Linear)."""
    keys = iter(jax.random.split(key, 512))
    nk = lambda: next(keys)

    params = {}
    conv1_out = 16
    params['conv1'] = dict(w=_init_conv(nk(), conv1_out, 3, (3, 5, 5)),
                           bn=_init_bn(nk(), conv1_out))

    def unit(num_in, num_mid, num_out, first):
        num_ix = num_mid // 4
        p = dict(
            i1=dict(bn=_init_bn(nk(), num_in),
                    w=_init_conv(nk(), num_ix, num_in, (1, 1, 1))),
            i2=dict(bn=_init_bn(nk(), num_ix),
                    w=_init_conv(nk(), num_in, num_ix, (1, 1, 1))),
            m1=dict(bn=_init_bn(nk(), num_in),
                    w=_init_conv(nk(), num_mid, num_in, (3, 3, 3), GROUPS)),
        )
        if first:
            p['m2'] = dict(bn=_init_bn(nk(), num_mid),
                           w=_init_conv(nk(), num_out, num_mid, (1, 1, 1)))
            p['w1'] = dict(bn=_init_bn(nk(), num_in),
                           w=_init_conv(nk(), num_out, num_in, (1, 1, 1)))
        else:
            p['m2'] = dict(bn=_init_bn(nk(), num_mid),
                           w=_init_conv(nk(), num_out, num_mid, (1, 3, 3),
                                        GROUPS))
        return p

    num_in, num_mid, num_out = conv1_out, 96, 96
    for s in (2, 3, 4, 5):
        blocks = []
        for i in range(1, K_SEC[s] + 1):
            blocks.append(unit(num_in if i == 1 else num_out,
                               num_mid, num_out, i == 1))
        params['conv%d' % s] = blocks
        num_in = num_out
        num_mid *= 2
        num_out *= 2

    conv5_out = num_in                                       # 768
    params['tail'] = _init_bn(nk(), conv5_out)
    params['fc'] = dict(
        w=math.sqrt(2.0 / (conv5_out + num_classes)) *
          jax.random.normal(nk(), (num_classes, conv5_out), F32),
        b=jnp.zeros((num_classes,), F32))
    return params


def _fold_bn(bn, eps=BN_EPS):
    scale = (bn['gamma'] / jnp.sqrt(bn['var'] + eps)).astype(F32)
    shift = (bn['beta'] - bn['mean'] * scale).astype(F32)
    return scale.reshape(1, -1), shift.reshape(1, -1)


def _pack_w_1x1(w):
    # PyTorch (Cout, Cin, 1, 1, 1) -> (Cin, Cout) bf16
    cout, cin = w.shape[0], w.shape[1]
    return jnp.transpose(w.reshape(cout, cin), (1, 0)).astype(BF16)


def _pack_w_spatial(w, g):
    # PyTorch (Cout, Cin/g, kt, kh, kw) -> (g, cg*taps, ng) bf16, rows ordered
    # (channel-within-group major, tap minor) to match the im2col columns.
    cout, cg, kt, kh, kw = w.shape
    ng = cout // g
    taps = kt * kh * kw
    wk = w.reshape(g, ng, cg, taps)
    wk = jnp.transpose(wk, (0, 2, 3, 1)).reshape(g, cg * taps, ng)
    return wk.astype(BF16)


def prepare_params(raw):
    """Fold BatchNorm into (scale, shift) and pre-pack conv/fc weights into the
    matmul layouts, once, outside the jitted forward."""
    def pack_1x1(layer):
        s, b = _fold_bn(layer['bn'])
        return dict(scale=s, shift=b, w=_pack_w_1x1(layer['w']))

    def pack_spatial(layer, g):
        s, b = _fold_bn(layer['bn'])
        return dict(scale=s, shift=b, w=_pack_w_spatial(layer['w'], g))

    p = {}
    s1, b1 = _fold_bn(raw['conv1']['bn'])
    p['conv1'] = dict(w=_pack_w_spatial(raw['conv1']['w'], 1),
                      scale=s1, shift=b1)
    for s in (2, 3, 4, 5):
        blocks = []
        for i, blk in enumerate(raw['conv%d' % s]):
            first = (i == 0)
            q = dict(i1=pack_1x1(blk['i1']),
                     i2=pack_1x1(blk['i2']),
                     m1=pack_spatial(blk['m1'], GROUPS))
            if first:
                q['m2'] = pack_1x1(blk['m2'])
                q['w1'] = pack_1x1(blk['w1'])
            else:
                q['m2'] = pack_spatial(blk['m2'], GROUPS)
            blocks.append(q)
        p['conv%d' % s] = blocks
    st, bt = _fold_bn(raw['tail'])
    p['tail'] = dict(scale=st, shift=bt)
    p['fc'] = dict(w=jnp.transpose(raw['fc']['w']).astype(BF16),
                   b=raw['fc']['b'].reshape(1, -1).astype(F32))
    return p


# ----------------------------------- self test ----------------------------------

def _self_test_grouped_conv():
    """Tiny grouped-conv check of the Pallas path against lax (bf16-matched)."""
    kx, kw = jax.random.split(jax.random.PRNGKey(42))
    g = 4
    x = jax.random.normal(kx, (1, 4, 8, 8, 8), F32)
    w = 0.1 * jax.random.normal(kw, (8, 8 // g, 3, 3, 3), F32)
    p = {'w': _pack_w_spatial(w, g)}
    out = jax.jit(lambda xx: conv_spatial(
        xx, p, (3, 3, 3), (1, 2, 2), (1, 1, 1), groups=g))(x)
    xb = x.astype(BF16).astype(F32)
    wb = w.astype(BF16).astype(F32)
    ref = jax.lax.conv_general_dilated(
        xb, jnp.transpose(wb, (2, 3, 4, 1, 0)),
        window_strides=(1, 2, 2), padding=((1, 1), (1, 1), (1, 1)),
        dimension_numbers=('NDHWC', 'DHWIO', 'NDHWC'),
        feature_group_count=g, precision=jax.lax.Precision.HIGHEST)
    assert jnp.allclose(out, ref, atol=1e-2, rtol=1e-2), \
        'grouped conv self-test failed'


# -------------------------------------- main -------------------------------------

if __name__ == '__main__':
    _self_test_grouped_conv()

    num_classes = 16
    num_segments = 16
    kp, kx = jax.random.split(jax.random.PRNGKey(0))
    params = prepare_params(init_params(kp, num_classes=num_classes))

    # Small deterministic test clip: batch 1, the 16 frames required by the
    # reference's hard-coded assert, 32x32 spatial. (The canonical MFNet input
    # is 224x224; the fused global-pool head generalizes AvgPool3d((8,7,7)) so
    # the same forward runs quickly at this reduced test resolution.)
    x = jax.random.normal(kx, (1, 3, num_segments, 32, 32), F32)

    fwd = jax.jit(functools.partial(mfnet3d_forward, num_segments=num_segments))
    logits = jax.block_until_ready(fwd(params, x))

    assert logits.shape == (1, num_classes)
    assert bool(jnp.all(jnp.isfinite(logits)))
    print("KERNEL_OK")
</pallas_src>

<mosaic_0001>
module attributes {stable_mosaic.version = 11 : i64} {
  func.func @kernel(%arg0: i32, %arg1: memref<64x216xbf16, #tpu.memory_space<vmem>>, %arg2: memref<4x54x2xbf16, #tpu.memory_space<vmem>>, %arg3: memref<64x8xf32, #tpu.memory_space<vmem>>) attributes {dimension_semantics = [#tpu.dimension_semantics<parallel>], iteration_bounds = array<i64: 1>, scalar_prefetch = 0 : i64, scratch_operands = 0 : i64, tpu.core_type = #tpu.core_type<tc>, window_params = [{transform_indices = @transform_0, window_bounds = array<i64: 64, 216>}, {pipeline_mode = #tpu.pipeline_mode<synchronous>, transform_indices = @transform_1, window_bounds = array<i64: 4, 54, 2>}, {transform_indices = @transform_2, window_bounds = array<i64: 64, 8>}]} {
    %c0 = arith.constant 0 : index
    %c0_0 = arith.constant 0 : index
    %0 = vector.load %arg1[%c0, %c0_0] : memref<64x216xbf16, #tpu.memory_space<vmem>>, vector<64x54xbf16>
    %c0_1 = arith.constant 0 : index
    %c0_2 = arith.constant 0 : index
    %c0_3 = arith.constant 0 : index
    %1 = vector.load %arg2[%c0_1, %c0_2, %c0_3] : memref<4x54x2xbf16, #tpu.memory_space<vmem>>, vector<1x54x2xbf16>
    %2 = vector.shape_cast %1 : vector<1x54x2xbf16> to vector<54x2xbf16>
    %cst = arith.constant dense<0.000000e+00> : vector<64x2xf32>
    %3 = tpu.matmul %0, %2, %cst {dimension_numbers = #tpu.dot_dimension_numbers<[1], [0], [0], [1], [0, 0, 1, 1], [], []>} : vector<64x54xbf16>, vector<54x2xbf16>, vector<64x2xf32> -> vector<64x2xf32>
    %c0_4 = arith.constant 0 : index
    %c0_5 = arith.constant 0 : index
    %4 = vector.load %arg3[%c0_4, %c0_5] : memref<64x8xf32, #tpu.memory_space<vmem>>, vector<64x2xf32>
    tpu.vector_store %arg3[%c0_4, %c0_5], %3 {strides = array<i32>} : memref<64x8xf32, #tpu.memory_space<vmem>>, vector<64x2xf32>,
    %c0_6 = arith.constant 0 : index
    %c54 = arith.constant 54 : index
    %5 = vector.load %arg1[%c0_6, %c54] : memref<64x216xbf16, #tpu.memory_space<vmem>>, vector<64x54xbf16>
    %c1 = arith.constant 1 : index
    %c0_7 = arith.constant 0 : index
    %c0_8 = arith.constant 0 : index
    %6 = vector.load %arg2[%c1, %c0_7, %c0_8] : memref<4x54x2xbf16, #tpu.memory_space<vmem>>, vector<1x54x2xbf16>
    %7 = vector.shape_cast %6 : vector<1x54x2xbf16> to vector<54x2xbf16>
    %cst_9 = arith.constant dense<0.000000e+00> : vector<64x2xf32>
    %8 = tpu.matmul %5, %7, %cst_9 {dimension_numbers = #tpu.dot_dimension_numbers<[1], [0], [0], [1], [0, 0, 1, 1], [], []>} : vector<64x54xbf16>, vector<54x2xbf16>, vector<64x2xf32> -> vector<64x2xf32>
    %c0_10 = arith.constant 0 : index
    %c2 = arith.constant 2 : index
    %9 = vector.load %arg3[%c0_10, %c2] : memref<64x8xf32, #tpu.memory_space<vmem>>, vector<64x2xf32>
    tpu.vector_store %arg3[%c0_10, %c2], %8 {strides = array<i32>} : memref<64x8xf32, #tpu.memory_space<vmem>>, vector<64x2xf32>,
    %c0_11 = arith.constant 0 : index
    %c108 = arith.constant 108 : index
    %10 = vector.load %arg1[%c0_11, %c108] : memref<64x216xbf16, #tpu.memory_space<vmem>>, vector<64x54xbf16>
    %c2_12 = arith.constant 2 : index
    %c0_13 = arith.constant 0 : index
    %c0_14 = arith.constant 0 : index
    %11 = vector.load %arg2[%c2_12, %c0_13, %c0_14] : memref<4x54x2xbf16, #tpu.memory_space<vmem>>, vector<1x54x2xbf16>
    %12 = vector.shape_cast %11 : vector<1x54x2xbf16> to vector<54x2xbf16>
    %cst_15 = arith.constant dense<0.000000e+00> : vector<64x2xf32>
    %13 = tpu.matmul %10, %12, %cst_15 {dimension_numbers = #tpu.dot_dimension_numbers<[1], [0], [0], [1], [0, 0, 1, 1], [], []>} : vector<64x54xbf16>, vector<54x2xbf16>, vector<64x2xf32> -> vector<64x2xf32>
    %c0_16 = arith.constant 0 : index
    %c4 = arith.constant 4 : index
    %14 = vector.load %arg3[%c0_16, %c4] : memref<64x8xf32, #tpu.memory_space<vmem>>, vector<64x2xf32>
    tpu.vector_store %arg3[%c0_16, %c4], %13 {strides = array<i32>} : memref<64x8xf32, #tpu.memory_space<vmem>>, vector<64x2xf32>,
    %c0_17 = arith.constant 0 : index
    %c162 = arith.constant 162 : index
    %15 = vector.load %arg1[%c0_17, %c162] : memref<64x216xbf16, #tpu.memory_space<vmem>>, vector<64x54xbf16>
    %c3 = arith.constant 3 : index
    %c0_18 = arith.constant 0 : index
    %c0_19 = arith.constant 0 : index
    %16 = vector.load %arg2[%c3, %c0_18, %c0_19] : memref<4x54x2xbf16, #tpu.memory_space<vmem>>, vector<1x54x2xbf16>
    %17 = vector.shape_cast %16 : vector<1x54x2xbf16> to vector<54x2xbf16>
    %cst_20 = arith.constant dense<0.000000e+00> : vector<64x2xf32>
    %18 = tpu.matmul %15, %17, %cst_20 {dimension_numbers = #tpu.dot_dimension_numbers<[1], [0], [0], [1], [0, 0, 1, 1], [], []>} : vector<64x54xbf16>, vector<54x2xbf16>, vector<64x2xf32> -> vector<64x2xf32>
    %c0_21 = arith.constant 0 : index
    %c6 = arith.constant 6 : index
    %19 = vector.load %arg3[%c0_21, %c6] : memref<64x8xf32, #tpu.memory_space<vmem>>, vector<64x2xf32>
    tpu.vector_store %arg3[%c0_21, %c6], %18 {strides = array<i32>} : memref<64x8xf32, #tpu.memory_space<vmem>>, vector<64x2xf32>,
    return
  }
  func.func @transform_0(%arg0: i32) -> (i32, i32) {
    %c0_i32 = arith.constant 0 : i32
    %c0_i32_0 = arith.constant 0 : i32
    return %arg0, %c0_i32 : i32, i32
  }
  func.func @transform_1(%arg0: i32) -> (i32, i32, i32) {
    %c0_i32 = arith.constant 0 : i32
    %c0_i32_0 = arith.constant 0 : i32
    %c0_i32_1 = arith.constant 0 : i32
    %c0_i32_2 = arith.constant 0 : i32
    return %c0_i32, %c0_i32_0, %c0_i32_1 : i32, i32, i32
  }
  func.func @transform_2(%arg0: i32) -> (i32, i32) {
    %c0_i32 = arith.constant 0 : i32
    %c0_i32_0 = arith.constant 0 : i32
    return %arg0, %c0_i32 : i32, i32
  }
}

</mosaic_0001>

<bundles_post_ra>
// kernel: _lambda_.1
= control target key start
LH: loop header
LB: loop body
LE: loop exit
PB: predicated region body
PF: predicated region fallthrough
CT: control target
= control target key end

     0   :  { %s1003_s11 = smov 74   ;;  %s1004_s22 = smov 20   ;;  %vm82_vm0 = vcmask 1042432   ;;  %vm69_vm1 = vcmask 441344   ;;  %s1226_s0 = inlined_call_operand.vmem [shape: bf16[64,216], index: 0, kind: input, shape index: {}]   ;;  %s1227_s1 = inlined_call_operand.vmem [shape: bf16[4,54,2], index: 1, kind: input, shape index: {}]   ;;  %s1228_s2 = inlined_call_operand.hbm [shape: f32[64,8], index: 2, kind: output, shape index: {}]  }
   0x1   :  { %v941_v0 = vld [vmem:[%s1226_s0 + $0x20] ss:$8 sps:$4 sm:$0xff]   ;;  %v943_v2 = vld [vmem:[%s1226_s0 + $0x30] ss:$8 sps:$4 sm:$0xff]   ;;  %v945_v4 = vld [vmem:[%s1226_s0 + $0x4] ss:$8 sps:$4 sm:$0xff]  }
   0x2   :  { %200 = vrot.lane.b32.xlu1 %v941_v0, %s1003_s11  ;;  %v942_v1 = vld [vmem:[%s1226_s0] ss:$8 sps:$4 sm:$0xff]   ;;  %v944_v3 = vld [vmem:[%s1226_s0 + $0x10] ss:$8 sps:$4 sm:$0xff]   ;;  %v948_v6 = vld [vmem:[%s1226_s0 + $0x14] ss:$8 sps:$4 sm:$0xff]  }
   0x3   :  { %196 = vrot.lane.b32.xlu0 %v942_v1, %s1003_s11  ;;  %v947_v5 = vld [vmem:[%s1226_s0] ss:$8 sps:$4 sm:$0xff]   ;;  %v950_v7 = vld [vmem:[%s1226_s0 + $0x10] ss:$8 sps:$4 sm:$0xff]   ;;  %v951_v8 = vld [vmem:[%s1226_s0 + $0x14] ss:$8 sps:$4 sm:$0xff]  }
   0x4   :  { %v961_v9 = vld [vmem:[%s1227_s1 + $0x18] ss:$0 sps:$4 sm:$0x77]   ;;  %v962_v10 = vld [vmem:[%s1227_s1 + $0x10] sm:$0xff]   ;;  %v952_v11 = vld [vmem:[%s1226_s0 + $0x4] ss:$8 sps:$4 sm:$0xff]  }
   0x5   :  { %v953_v12 = vld [vmem:[%s1226_s0 + $0x24] ss:$8 sps:$4 sm:$0xff]   ;;  %928 = vmatprep.subr.msk.bf16.mxu0 %vm82_vm0, %v961_v9  ;;  %v84_v13 = vsel %vm82_vm0, %v961_v9, 0  ;;  %v965_v15 = vld [vmem:[%s1227_s1 + $0x34] ss:$0 sps:$4 sm:$0x77]  }
   0x6   :  { %202 = vrot.lane.b32.xlu1 %v943_v2, %s1003_s11  ;;  %865 = vmatpush3.bf16.msra.mxu0 %v84_v13  ;;  %v963_v14 = vld [vmem:[%s1227_s1 + $0x8] sm:$0xff]   ;;  %s1005_s13 = smov 94   ;;  %v238_v18 = vsel %vm82_vm0, %v965_v15, 0  ;;  %v956_v21 = vld [vmem:[%s1226_s0 + $0x34] ss:$8 sps:$4 sm:$0xff]   ;;  %v964_v22 = vld [vmem:[%s1227_s1] sm:$0xff]  }
   0x7   :  { %198 = vrot.lane.b32.xlu0 %v944_v3, %s1003_s11  ;;  %v955_v16 = vld [vmem:[%s1226_s0 + $0x20] ss:$8 sps:$4 sm:$0xff]   ;;  %866 = vmatprep.subr.bf16.mxu0 %v962_v10  ;;  %v968_v19 = vld [vmem:[%s1227_s1 + $0x2c] sm:$0xff]   ;;  %v960_v24 = vld [vmem:[%s1226_s0 + $0x34] ss:$8 sps:$4 sm:$0xff]  }
   0x8   :  { %v966_v17 = vld [vmem:[%s1226_s0] ss:$8 sps:$4 sm:$0xff]   ;;  %929 = vmatprep.subr.msk.bf16.mxu1 %vm82_vm0, %v965_v15  ;;  %v958_v23 = vld [vmem:[%s1226_s0 + $0x30] ss:$8 sps:$4 sm:$0xff]   ;;  %v959_v27 = vld [vmem:[%s1226_s0 + $0x24] ss:$8 sps:$4 sm:$0xff]  }
   0x9   :  { %881 = vmatpush3.bf16.msra.mxu1 %v238_v18  ;;  %v969_v20 = vld [vmem:[%s1227_s1 + $0x24] sm:$0xff]   ;;  %872 = vmatprep.mubr.msk.bf16.mxu0 %vm69_vm1, %v966_v17  ;;  %v970_v25 = vld [vmem:[%s1227_s1 + $0x50] ss:$0 sps:$4 sm:$0x77]   ;;  %v973_v26 = vld [vmem:[%s1227_s1 + $0x1c] sm:$0xff]  }
   0xa   :  { %396 = vrot.lane.b32.xlu1 %v945_v4, %s1004_s22  ;;  %867 = vmatpush3.bf16.msra.mxu0 %v962_v10  ;;  %v967_v28 = vld [vmem:[%s1226_s0 + $0x10] ss:$8 sps:$4 sm:$0xff]   ;;  %v976_v29 = vld [vmem:[%s1227_s1 + $0x6c] ss:$0 sps:$4 sm:$0x77]   ;;  %v449_v32 = vsel %vm82_vm0, %v970_v25, 0 }
   0xb   :  { %394 = vrot.lane.b32.xlu0 %v947_v5, %s1004_s22  ;;  %868 = vmatprep.subr.bf16.mxu0 %v963_v14  ;;  %v971_v30 = vld [vmem:[%s1226_s0 + $0x20] ss:$8 sps:$4 sm:$0xff]   ;;  %v635_v31 = vsel %vm82_vm0, %v976_v29, 0 }
   0xc   :  { %882 = vmatprep.subr.bf16.mxu1 %v968_v19  ;;  %v974_v33 = vld [vmem:[%s1227_s1 + $0x48] sm:$0xff]  }
   0xd   :  { %883 = vmatpush3.bf16.msra.mxu1 %v968_v19 }
   0xe   :  { %400 = vrot.lane.b32.xlu1 %v948_v6, %s1004_s22  ;;  %869 = vmatpush3.bf16.msra.mxu0 %v963_v14 }
   0xf   :  { %398 = vrot.lane.b32.xlu0 %v950_v7, %s1004_s22  ;;  %884 = vmatprep.subr.bf16.mxu1 %v969_v20 }
  0x10   :  { %870 = vmatprep.subr.bf16.mxu0 %v964_v22 }
  0x11   :  { %885 = vmatpush3.bf16.msra.mxu1 %v969_v20 }
  0x12   :  { %595 = vrot.lane.b32.xlu1 %v951_v8, %s1005_s13  ;;  %871 = vmatpush3.bf16.msra.mxu0 %v964_v22 }
  0x13   :  { %593 = vrot.lane.b32.xlu0 %v952_v11, %s1005_s13  ;;  %886 = vmatprep.subr.bf16.mxu1 %v973_v26 }
  0x14   :  { %930 = vmatprep.subr.msk.bf16.mxu0 %vm82_vm0, %v970_v25 }
  0x15   :  { %873 = vmatmul.mubr.msk.bf16.vlgmr.msra.gmra.mxu0 %vm69_vm1, %v967_v28 }
  0x16   :  { %404 = vrot.lane.b32.xlu1 %v953_v12, %s1004_s22 }
  0x17   :  { %402 = vrot.lane.b32.xlu0 %v955_v16, %s1004_s22 }
  0x1a   :  { %408 = vrot.lane.b32.xlu1 %v956_v21, %s1004_s22 }
  0x1b   :  { %406 = vrot.lane.b32.xlu0 %v958_v23, %s1004_s22 }
  0x1e   :  { %599 = vrot.lane.b32.xlu1 %v960_v24, %s1005_s13 }
  0x1f   :  { %597 = vrot.lane.b32.xlu0 %v959_v27, %s1005_s13 }
  0x20   :  { %7 = vsyncpa [#allocation3], 0  ;;  %897 = vmatpush3.bf16.msra.mxu0 %v449_v32  ;;  %876 = vmatprep.mubr.msk.bf16.mxu0 %vm69_vm1, %v971_v30  ;;  %v975_v34 = vld [vmem:[%s1227_s1 + $0x40] sm:$0xff]   ;;  %v972_v35 = vld [vmem:[%s1226_s0 + $0x30] ss:$8 sps:$4 sm:$0xff]   ;;  %vm410_vm2 = vcmask 162816  }
  0x21   :  { %898 = vmatprep.subr.bf16.mxu0 %v974_v33  ;;  %887 = vmatpush3.bf16.msra.mxu1 %v973_v26  ;;  %v977_v36 = vld [vmem:[%s1227_s1 + $0x38] sm:$0xff]   ;;  %v978_v40 = vld [vmem:[%s1227_s1 + $0x64] sm:$0xff]   ;;  %vm151_vm3 = vcmask 15360   ;;  %s1007_s28 = smov 4   ;;  %s1008_s29 = smov 6   ;;  %vm337_vm4 = vcmask 31760  }
  0x22   :  { %931 = vmatprep.subr.msk.bf16.mxu1 %vm82_vm0, %v976_v29  ;;  %877 = vmatmul.mubr.msk.bf16.gmra.mxu0 %vm69_vm1, %v972_v35  ;;  %v979_v43 = vld [vmem:[%s1227_s1 + $0x5c] sm:$0xff]   ;;  %v980_v47 = vld [vmem:[%s1227_s1 + $0x54] sm:$0xff]   ;;  %s1006_s1 = smov 2   ;;  %vm548_vm5 = vcmask 48160   ;;  %vm734_vm6 = vcmask 64560   ;;  %s1009_s30 = smov [#allocation2]  }
  0x23   :  { %s748_s3 = sshll.u32 %s1009_s30, 4  ;;  %s749_s3 = int_to_ptr.vmem [resolvable:$true] %s748_s3 }
  0x24   :  { %899 = vmatpush3.bf16.msra.mxu0 %v974_v33  ;;  %s981_s4 = scalar_lea.vmem %s749_s3, 1024  ;;  %p986_p1 = scmp.lt.s32.totalorder %s749_s3, %s749_s3 }
  0x25   :  { %900 = vmatprep.subr.bf16.mxu0 %v975_v34  ;;  %p982_p0 = scmp.ne.s32.totalorder %s749_s3, %s981_s4  ;;  %p987_p2 = scmp.lt.s32.totalorder %s981_s4, %s981_s4 }
  0x27   :  { %p988_p3 = por %p987_p2, %p986_p1 }
  0x28   :  { %901 = vmatpush3.bf16.msra.mxu0 %v975_v34 }
  0x29   :  { %902 = vmatprep.subr.bf16.mxu0 %v977_v36  ;;  %p989_p4 = pnand %p988_p3, %p982_p0 }
  0x2c   :  { %903 = vmatpush3.bf16.msra.mxu0 %v977_v36 }
  0x74   :  { %v201_v37 = vpop.permute.xlu1 %200 }
  0x75   :  { %v197_v38 = vpop.permute.xlu0 %196 }
  0x76   :  { %888 = vmatprep.mubr.msk.bf16.mxu1 %vm69_vm1, %v197_v38 }
  0x78   :  { %v203_v39 = vpop.permute.xlu1 %202 }
  0x79   :  { %v199_v41 = vpop.permute.xlu0 %198 }
  0x7a   :  { %889 = vmatmul.mubr.msk.bf16.vlgmr.msra.gmra.mxu1 %vm69_vm1, %v199_v41 }
  0x7b   :  { %892 = vmatprep.mubr.msk.bf16.mxu1 %vm69_vm1, %v201_v37  ;;  %913 = vmatpush3.bf16.msra.mxu1 %v635_v31 }
  0x7c   :  { %v397_v42 = vpop.permute.xlu1 %396  ;;  %914 = vmatprep.subr.bf16.mxu1 %v978_v40 }
  0x7d   :  { %v395_v44 = vpop.permute.xlu0 %394 }
  0x7e   :  { %v411_v45 = vsel %vm410_vm2, %v395_v44, %v397_v42 }
  0x7f   :  { %904 = vmatprep.mubr.msk.bf16.mxu0 %vm69_vm1, %v411_v45  ;;  %915 = vmatpush3.bf16.msra.mxu1 %v978_v40 }
  0x80   :  { %v401_v46 = vpop.permute.xlu1 %400  ;;  %916 = vmatprep.subr.bf16.mxu1 %v979_v43 }
  0x81   :  { %v399_v48 = vpop.permute.xlu0 %398 }
  0x82   :  { %v412_v49 = vsel %vm410_vm2, %v399_v48, %v401_v46  ;;  %893 = vmatmul.mubr.msk.bf16.gmra.mxu1 %vm69_vm1, %v203_v39 }
  0x83   :  { %905 = vmatmul.mubr.msk.bf16.vlgmr.msra.gmra.mxu0 %vm69_vm1, %v412_v49  ;;  %917 = vmatpush3.bf16.msra.mxu1 %v979_v43 }
  0x84   :  { %v596_v50 = vpop.permute.xlu1 %595  ;;  %918 = vmatprep.subr.bf16.mxu1 %v980_v47 }
  0x85   :  { %v594_v51 = vpop.permute.xlu0 %593 }
  0x86   :  { %920 = vmatprep.mubr.msk.bf16.mxu1 %vm69_vm1, %v594_v51 }
  0x87   :  { %919 = vmatpush3.bf16.msra.mxu1 %v980_v47 }
  0x88   :  { %v405_v52 = vpop.permute.xlu1 %404 }
  0x89   :  { %v403_v53 = vpop.permute.xlu0 %402 }
  0x8a   :  { %v413_v54 = vsel %vm410_vm2, %v403_v53, %v405_v52  ;;  %921 = vmatmul.mubr.msk.bf16.vlgmr.msra.gmra.mxu1 %vm69_vm1, %v596_v50 }
  0x8b   :  { %908 = vmatprep.mubr.msk.bf16.mxu0 %vm69_vm1, %v413_v54 }
  0x8c   :  { %v409_v55 = vpop.permute.xlu1 %408 }
  0x8d   :  { %v407_v56 = vpop.permute.xlu0 %406 }
  0x8e   :  { %v414_v57 = vsel %vm410_vm2, %v407_v56, %v409_v55 }
  0x8f   :  { %909 = vmatmul.mubr.msk.bf16.gmra.mxu0 %vm69_vm1, %v414_v57 }
  0x90   :  { %v600_v58 = vpop.permute.xlu1 %599 }
  0x91   :  { %v598_v59 = vpop.permute.xlu0 %597 }
  0x92   :  { %924 = vmatprep.mubr.msk.bf16.mxu1 %vm69_vm1, %v598_v59 }
  0x93   :  { %925 = vmatmul.mubr.msk.bf16.gmra.mxu1 %vm69_vm1, %v600_v58 }
  0xd5   :  { %v874_v60 = vpop.f32.mrf.mxu0 }
  0xd6   :  { %154 = vst.msk [vmem:[#allocation2 + $0x10] sm:$0xff] %vm151_vm3, %v874_v60 }
  0xd7   :  { %v120_v61 = vpop.f32.mrf.mxu0 }
  0xd8   :  { %152 = vst.msk [vmem:[#allocation2] sm:$0xff] %vm151_vm3, %v120_v61 }
  0xd9   :  { %v875_v62 = vpop.f32.mrf.mxu0 }
  0xda   :  { %155 = vst.msk [vmem:[#allocation2 + $0x18] sm:$0xff] %vm151_vm3, %v875_v62 }
  0xdb   :  { %v123_v63 = vpop.f32.mrf.mxu0 }
  0xdc   :  { %153 = vst.msk [vmem:[#allocation2 + $0x8] sm:$0xff] %vm151_vm3, %v123_v63 }
  0xe2   :  { %v878_v0 = vpop.f32.mrf.mxu0 }
  0xe3   :  { %158 = vst.msk [vmem:[#allocation2 + $0x30] sm:$0xff] %vm151_vm3, %v878_v0 }
  0xe4   :  { %v136_v1 = vpop.f32.mrf.mxu0 }
  0xe5   :  { %156 = vst.msk [vmem:[#allocation2 + $0x20] sm:$0xff] %vm151_vm3, %v136_v1 }
  0xe6   :  { %v879_v2 = vpop.f32.mrf.mxu0 }
  0xe7   :  { %159 = vst.msk [vmem:[#allocation2 + $0x38] sm:$0xff] %vm151_vm3, %v879_v2 }
  0xe8   :  { %v139_v3 = vpop.f32.mrf.mxu0 }
  0xe9   :  { %157 = vst.msk [vmem:[#allocation2 + $0x28] sm:$0xff] %vm151_vm3, %v139_v3 }
 0x13a   :  { %v890_v4 = vpop.f32.mrf.mxu1 }
 0x13b   :  { %317 = vrot.lane.b32.xlu0 %v890_v4, %s1006_s1 }
 0x13c   :  { %v274_v5 = vpop.f32.mrf.mxu1 }
 0x13e   :  { %v891_v6 = vpop.f32.mrf.mxu1 }
 0x13f   :  { %319 = vrot.lane.b32.xlu1 %v891_v6, %s1006_s1 }
 0x140   :  { %v277_v7 = vpop.f32.mrf.mxu1 }
 0x142   :  { %v894_v8 = vpop.f32.mrf.mxu1 }
 0x143   :  { %v906_v9 = vpop.f32.mrf.mxu0 }
 0x144   :  { %528 = vrot.lane.b32.xlu0 %v906_v9, %s1007_s28  ;;  %v290_v10 = vpop.f32.mrf.mxu1 }
 0x145   :  { %v485_v11 = vpop.f32.mrf.mxu0 }
 0x146   :  { %v895_v13 = vpop.f32.mrf.mxu1 }
 0x147   :  { %v907_v12 = vpop.f32.mrf.mxu0 }
 0x148   :  { %313 = vrot.lane.b32.xlu0 %v274_v5, %s1006_s1  ;;  %530 = vrot.lane.b32.xlu1 %v907_v12, %s1007_s28  ;;  %v293_v14 = vpop.f32.mrf.mxu1 }
 0x149   :  { %v488_v15 = vpop.f32.mrf.mxu0 }
 0x14a   :  { %v922_v17 = vpop.f32.mrf.mxu1 }
 0x14c   :  { %524 = vrot.lane.b32.xlu0 %v485_v11, %s1007_s28  ;;  %315 = vrot.lane.b32.xlu1 %v277_v7, %s1006_s1  ;;  %v671_v19 = vpop.f32.mrf.mxu1 }
 0x14e   :  { %v923_v21 = vpop.f32.mrf.mxu1 }
 0x14f   :  { %v910_v16 = vpop.f32.mrf.mxu0 }
 0x150   :  { %325 = vrot.lane.b32.xlu0 %v894_v8, %s1006_s1  ;;  %526 = vrot.lane.b32.xlu1 %v488_v15, %s1007_s28  ;;  %v674_v22 = vpop.f32.mrf.mxu1 }
 0x151   :  { %v501_v18 = vpop.f32.mrf.mxu0 }
 0x153   :  { %v911_v20 = vpop.f32.mrf.mxu0  ;;  %v926_v24 = vpop.f32.mrf.mxu1 }
 0x154   :  { %327 = vrot.lane.b32.xlu1 %v895_v13, %s1006_s1  ;;  %536 = vrot.lane.b32.xlu0 %v910_v16, %s1007_s28 }
 0x155   :  { %v504_v23 = vpop.f32.mrf.mxu0  ;;  %v687_v25 = vpop.f32.mrf.mxu1 }
 0x157   :  { %v927_v26 = vpop.f32.mrf.mxu1 }
 0x158   :  { %321 = vrot.lane.b32.xlu0 %v290_v10, %s1006_s1  ;;  %538 = vrot.lane.b32.xlu1 %v911_v20, %s1007_s28 }
 0x159   :  { %v690_v27 = vpop.f32.mrf.mxu1 }
 0x15c   :  { %532 = vrot.lane.b32.xlu0 %v501_v18, %s1007_s28  ;;  %323 = vrot.lane.b32.xlu1 %v293_v14, %s1006_s1 }
 0x160   :  { %714 = vrot.lane.b32.xlu0 %v922_v17, %s1008_s29  ;;  %534 = vrot.lane.b32.xlu1 %v504_v23, %s1007_s28 }
 0x164   :  { %710 = vrot.lane.b32.xlu0 %v671_v19, %s1008_s29  ;;  %716 = vrot.lane.b32.xlu1 %v923_v21, %s1008_s29 }
 0x168   :  { %718 = vrot.lane.b32.xlu0 %v687_v25, %s1008_s29  ;;  %712 = vrot.lane.b32.xlu1 %v674_v22, %s1008_s29 }
 0x16c   :  { %722 = vrot.lane.b32.xlu0 %v926_v24, %s1008_s29  ;;  %720 = vrot.lane.b32.xlu1 %v690_v27, %s1008_s29 }
 0x170   :  { %724 = vrot.lane.b32.xlu1 %v927_v26, %s1008_s29 }
 0x1ad   :  { %v318_v28 = vpop.permute.xlu0 %317 }
 0x1ae   :  { %340 = vst.msk [vmem:[#allocation2 + $0x10] sm:$0xff] %vm337_vm4, %v318_v28 }
 0x1b1   :  { %v320_v29 = vpop.permute.xlu1 %319 }
 0x1b2   :  { %341 = vst.msk [vmem:[#allocation2 + $0x18] sm:$0xff] %vm337_vm4, %v320_v29 }
 0x1b6   :  { %v529_v30 = vpop.permute.xlu0 %528 }
 0x1b7   :  { %551 = vst.msk [vmem:[#allocation2 + $0x10] sm:$0xff] %vm548_vm5, %v529_v30 }
 0x1ba   :  { %v314_v31 = vpop.permute.xlu0 %313  ;;  %v531_v32 = vpop.permute.xlu1 %530 }
 0x1bb   :  { %338 = vst.msk [vmem:[#allocation2] sm:$0xff] %vm337_vm4, %v314_v31 }
 0x1bc   :  { %552 = vst.msk [vmem:[#allocation2 + $0x18] sm:$0xff] %vm548_vm5, %v531_v32 }
 0x1be   :  { %v525_v33 = vpop.permute.xlu0 %524  ;;  %v316_v34 = vpop.permute.xlu1 %315 }
 0x1bf   :  { %549 = vst.msk [vmem:[#allocation2] sm:$0xff] %vm548_vm5, %v525_v33 }
 0x1c0   :  { %339 = vst.msk [vmem:[#allocation2 + $0x8] sm:$0xff] %vm337_vm4, %v316_v34 }
 0x1c2   :  { %v326_v35 = vpop.permute.xlu0 %325  ;;  %v527_v36 = vpop.permute.xlu1 %526 }
 0x1c3   :  { %344 = vst.msk [vmem:[#allocation2 + $0x30] sm:$0xff] %vm337_vm4, %v326_v35 }
 0x1c4   :  { %550 = vst.msk [vmem:[#allocation2 + $0x8] sm:$0xff] %vm548_vm5, %v527_v36 }
 0x1c6   :  { %v328_v37 = vpop.permute.xlu1 %327  ;;  %v537_v38 = vpop.permute.xlu0 %536 }
 0x1c7   :  { %345 = vst.msk [vmem:[#allocation2 + $0x38] sm:$0xff] %vm337_vm4, %v328_v37 }
 0x1c8   :  { %555 = vst.msk [vmem:[#allocation2 + $0x30] sm:$0xff] %vm548_vm5, %v537_v38 }
 0x1ca   :  { %v322_v39 = vpop.permute.xlu0 %321  ;;  %v539_v40 = vpop.permute.xlu1 %538 }
 0x1cb   :  { %342 = vst.msk [vmem:[#allocation2 + $0x20] sm:$0xff] %vm337_vm4, %v322_v39 }
 0x1cc   :  { %556 = vst.msk [vmem:[#allocation2 + $0x38] sm:$0xff] %vm548_vm5, %v539_v40 }
 0x1ce   :  { %v533_v41 = vpop.permute.xlu0 %532  ;;  %v324_v42 = vpop.permute.xlu1 %323 }
 0x1cf   :  { %553 = vst.msk [vmem:[#allocation2 + $0x20] sm:$0xff] %vm548_vm5, %v533_v41 }
 0x1d0   :  { %343 = vst.msk [vmem:[#allocation2 + $0x28] sm:$0xff] %vm337_vm4, %v324_v42 }
 0x1d2   :  { %v715_v43 = vpop.permute.xlu0 %714  ;;  %v535_v44 = vpop.permute.xlu1 %534 }
 0x1d3   :  { %737 = vst.msk [vmem:[#allocation2 + $0x10] sm:$0xff] %vm734_vm6, %v715_v43 }
 0x1d4   :  { %554 = vst.msk [vmem:[#allocation2 + $0x28] sm:$0xff] %vm548_vm5, %v535_v44 }
 0x1d6   :  { %v711_v45 = vpop.permute.xlu0 %710  ;;  %v717_v46 = vpop.permute.xlu1 %716 }
 0x1d7   :  { %735 = vst.msk [vmem:[#allocation2] sm:$0xff] %vm734_vm6, %v711_v45  ;;  %738 = vst.msk [vmem:[#allocation2 + $0x18] sm:$0xff] %vm734_vm6, %v717_v46 }
 0x1da   :  { %v719_v47 = vpop.permute.xlu0 %718  ;;  %v713_v48 = vpop.permute.xlu1 %712 }
 0x1db   :  { %739 = vst.msk [vmem:[#allocation2 + $0x20] sm:$0xff] %vm734_vm6, %v719_v47  ;;  %736 = vst.msk [vmem:[#allocation2 + $0x8] sm:$0xff] %vm734_vm6, %v713_v48 }
 0x1de   :  { %v723_v49 = vpop.permute.xlu0 %722  ;;  %v721_v50 = vpop.permute.xlu1 %720 }
 0x1df   :  { %741 = vst.msk [vmem:[#allocation2 + $0x30] sm:$0xff] %vm734_vm6, %v723_v49  ;;  %740 = vst.msk [vmem:[#allocation2 + $0x28] sm:$0xff] %vm734_vm6, %v721_v50 }
 0x1e2   :  { %v725_v51 = vpop.permute.xlu1 %724 }
 0x1e3   :  { %742 = vst.msk [vmem:[#allocation2 + $0x38] sm:$0xff] %vm734_vm6, %v725_v51 }
 0x1e4   :  { %992 = shalt.err (!%p989_p4)
}
 0x1e5   :  { %s1010_s5 = smov 128   ;;  %s1011_s6 = smov 8  }
 0x1e6   :  { %754 = dma.vmem_to_hbm [thread:$0]  %s749_s3, 1024, %s1228_s2, [#allocation3], %s1010_s5, %s1010_s5, %s1011_s6  }
 0x1e7   :  { %1001 = dma.done.wait [#allocation3], 1024  }
 0x1e8   :  { %1002 = vsyncadd [#allocation3], 4294966272 }
 0x1e9   :  { %758 = vsyncpa [#allocation3], 1 }

</bundles_post_ra>
